<compile_context>
chip_gen: v6e
topology: v6e:2x2x1
jax: 0.10.0
libtpu: 0.0.40
codegen_flags: <defaults>
</compile_context>

<pallas_src>
import jax
import jax.numpy as jnp
from jax.experimental import pallas as pl
from jax.experimental.pallas import tpu as pltpu


def _round_up(n, m):
    return ((n + m - 1) // m) * m


# ------------------------- Pallas kernel -------------------------

def _make_fused_mlp_kernel(n_layers):
    """Fused (Linear -> act) x n_layers kernel.

    Ref order: x_ref, (w0, b0), (w1, b1), ..., o_ref
      x_ref : (TB, D_in)        f32   batch tile
      w_i   : (D_i, D_{i+1})    bf16  full weight, resident in VMEM
      b_i   : (1, D_{i+1})      f32
      o_ref : (TB, D_out)       f32
    Hidden layers get ReLU; last layer gets sigmoid (the trailing Sigmoid()).
    """

    def kernel(x_ref, *refs):
        o_ref = refs[-1]
        wb_refs = refs[:-1]
        h = x_ref[...]                                  # (TB, D_in) f32
        for i in range(n_layers):
            w = wb_refs[2 * i][...]                     # bf16 weights
            b = wb_refs[2 * i + 1][...]                 # f32 bias (1, D_out_i)
            # MXU matmul: bf16 x bf16 -> f32 accumulate; elementwise in f32.
            y = jnp.dot(h.astype(w.dtype), w,
                        preferred_element_type=jnp.float32) + b
            if i < n_layers - 1:
                h = jnp.maximum(y, 0.0)                 # ReLU
            else:
                h = jax.nn.sigmoid(y)                   # final Sigmoid (EUP)
        o_ref[...] = h.astype(o_ref.dtype)

    return kernel


def fused_mlp_forward(params, x, *, batch_tile=128):
    """Run the whole MLP (+ sigmoid) in one Pallas call.

    params: list of (w, b) with w:(d_in, d_out) bf16 (pre-transposed vs torch),
            b:(1, d_out) f32.
    x:      any (batch, ...) array; flattened like torch's reshape(batch, -1).
    """
    batch = x.shape[0]
    x2 = x.reshape(batch, -1).astype(jnp.float32)
    d_in = x2.shape[1]
    d_out = params[-1][0].shape[1]
    n_layers = len(params)

    # Batch tiling: sublane-aligned (multiple of 8 for f32), capped at
    # `batch_tile` rows per grid step; pad batch and slice result back.
    tb = min(batch_tile, _round_up(batch, 8))
    padded = _round_up(batch, tb)
    if padded != batch:
        x2 = jnp.pad(x2, ((0, padded - batch), (0, 0)))
    n_tiles = padded // tb

    in_specs = [pl.BlockSpec((tb, d_in), lambda i: (i, 0))]
    args = [x2]
    for w, b in params:
        di, do = w.shape
        # Full-array blocks with a constant index_map: weights/biases are
        # DMA'd once and stay resident across all batch tiles.
        in_specs.append(pl.BlockSpec((di, do), lambda i: (0, 0)))
        in_specs.append(pl.BlockSpec((1, do), lambda i: (0, 0)))
        args.append(w)
        args.append(b)

    flops = 2 * padded * sum(w.shape[0] * w.shape[1] for w, _ in params)
    bytes_accessed = (
        x2.size * 4 + padded * d_out * 4
        + sum(w.size * w.dtype.itemsize + b.size * 4 for w, b in params)
    )
    cost = pl.CostEstimate(
        flops=flops,
        transcendentals=padded * d_out,      # sigmoid exps
        bytes_accessed=bytes_accessed,
    )

    out = pl.pallas_call(
        _make_fused_mlp_kernel(n_layers),
        out_shape=jax.ShapeDtypeStruct((padded, d_out), jnp.float32),
        grid=(n_tiles,),
        in_specs=in_specs,
        out_specs=pl.BlockSpec((tb, d_out), lambda i: (i, 0)),
        compiler_params=pltpu.CompilerParams(
            dimension_semantics=("parallel",)),   # batch tiles shard across TCs on v7x
        cost_estimate=cost,
    )(*args)
    return out[:batch]


# ------------------------- Model wrapper -------------------------

class MLPOrdinalModelPallas:
    """JAX/Pallas re-implementation of MLPOrdinalModel (use_batch_norm=False)."""

    def __init__(self, input_dim, output_dim, hidden_dims, key):
        self.input_dim = input_dim
        self.output_dim = output_dim
        dims = [input_dim] + list(hidden_dims) + [output_dim]
        self.params = []
        for i in range(len(dims) - 1):
            key, kw, kb = jax.random.split(key, 3)
            fan_in = dims[i]
            bound = 1.0 / float(fan_in) ** 0.5
            # Mirrors torch.nn.Linear's U(-1/sqrt(fan_in), 1/sqrt(fan_in)).
            # Weights stored pre-transposed (in, out) and cast to bf16 once;
            # biases stay f32 and are pre-reshaped to (1, out).
            w = jax.random.uniform(kw, (dims[i], dims[i + 1]),
                                   minval=-bound, maxval=bound,
                                   dtype=jnp.float32).astype(jnp.bfloat16)
            b = jax.random.uniform(kb, (1, dims[i + 1]),
                                   minval=-bound, maxval=bound,
                                   dtype=jnp.float32)
            self.params.append((w, b))

    def __call__(self, x):
        return fused_mlp_forward(self.params, x)


# ------------------------- Reference (pure JAX) -------------------------

def reference_forward(params, x):
    """Same math as the kernel: bf16 matmul operands, f32 accumulate/elementwise."""
    x = x.reshape(x.shape[0], -1).astype(jnp.float32)
    n = len(params)
    for i, (w, b) in enumerate(params):
        y = jnp.dot(x.astype(w.dtype).astype(jnp.float32),
                    w.astype(jnp.float32),
                    precision="highest") + b
        if i < n - 1:
            x = jnp.maximum(y, 0.0)
        else:
            x = jax.nn.sigmoid(y)
    return x


# ------------------------- Main -------------------------

if __name__ == "__main__":
    key = jax.random.PRNGKey(0)
    key, kx, kp = jax.random.split(key, 3)

    # Example input: NCHW image-like tensor, flattened by the model.
    batch, C, H, W = 2, 4, 16, 16
    x = jax.random.normal(kx, (batch, C, H, W), dtype=jnp.float32)

    input_dim = C * H * W      # 1024
    hidden_dims = (32, 32)
    output_dim = 8

    model = MLPOrdinalModelPallas(input_dim, output_dim, hidden_dims, kp)

    out = model(x)
    out = jax.block_until_ready(out)

    # Cross-check against a pure-JAX reference of the same (bf16-weight) math.
    ref = reference_forward(model.params, x)
    assert out.shape == (batch, output_dim)
    assert jnp.allclose(out, ref, atol=2e-3, rtol=1e-3), "mismatch vs reference"

    print("KERNEL_OK")
</pallas_src>

<mosaic_0001>
module attributes {stable_mosaic.version = 11 : i64} {
  func.func @kernel(%arg0: i32, %arg1: memref<8x1024xf32, #tpu.memory_space<vmem>>, %arg2: memref<1024x32xbf16, #tpu.memory_space<vmem>>, %arg3: memref<1x32xf32, #tpu.memory_space<vmem>>, %arg4: memref<32x32xbf16, #tpu.memory_space<vmem>>, %arg5: memref<1x32xf32, #tpu.memory_space<vmem>>, %arg6: memref<32x8xbf16, #tpu.memory_space<vmem>>, %arg7: memref<1x8xf32, #tpu.memory_space<vmem>>, %arg8: memref<8x8xf32, #tpu.memory_space<vmem>>) attributes {dimension_semantics = [#tpu.dimension_semantics<parallel>], iteration_bounds = array<i64: 1>, scalar_prefetch = 0 : i64, scratch_operands = 0 : i64, tpu.core_type = #tpu.core_type<tc>, window_params = [{transform_indices = @transform_0, window_bounds = array<i64: 8, 1024>}, {pipeline_mode = #tpu.pipeline_mode<synchronous>, transform_indices = @transform_1, window_bounds = array<i64: 1024, 32>}, {pipeline_mode = #tpu.pipeline_mode<synchronous>, transform_indices = @transform_2, window_bounds = array<i64: 1, 32>}, {pipeline_mode = #tpu.pipeline_mode<synchronous>, transform_indices = @transform_3, window_bounds = array<i64: 32, 32>}, {pipeline_mode = #tpu.pipeline_mode<synchronous>, transform_indices = @transform_4, window_bounds = array<i64: 1, 32>}, {pipeline_mode = #tpu.pipeline_mode<synchronous>, transform_indices = @transform_5, window_bounds = array<i64: 32, 8>}, {pipeline_mode = #tpu.pipeline_mode<synchronous>, transform_indices = @transform_6, window_bounds = array<i64: 1, 8>}, {transform_indices = @transform_7, window_bounds = array<i64: 8, 8>}]} {
    %c0 = arith.constant 0 : index
    %c0_0 = arith.constant 0 : index
    %0 = vector.load %arg1[%c0, %c0_0] : memref<8x1024xf32, #tpu.memory_space<vmem>>, vector<8x1024xf32>
    %c0_1 = arith.constant 0 : index
    %c0_2 = arith.constant 0 : index
    %1 = vector.load %arg2[%c0_1, %c0_2] : memref<1024x32xbf16, #tpu.memory_space<vmem>>, vector<1024x32xbf16>
    %c0_3 = arith.constant 0 : index
    %c0_4 = arith.constant 0 : index
    %2 = vector.load %arg3[%c0_3, %c0_4] : memref<1x32xf32, #tpu.memory_space<vmem>>, vector<1x32xf32>
    %3 = arith.truncf %0 : vector<8x1024xf32> to vector<8x1024xbf16>
    %cst = arith.constant dense<0.000000e+00> : vector<8x32xf32>
    %4 = tpu.matmul %3, %1, %cst {dimension_numbers = #tpu.dot_dimension_numbers<[1], [0], [0], [1], [0, 0, 1, 1], [], []>} : vector<8x1024xbf16>, vector<1024x32xbf16>, vector<8x32xf32> -> vector<8x32xf32>
    %5 = vector.broadcast %2 : vector<1x32xf32> to vector<8x32xf32>
    %6 = arith.addf %4, %5 : vector<8x32xf32>
    %cst_5 = arith.constant 0.000000e+00 : f32
    %7 = vector.broadcast %cst_5 : f32 to vector<8x32xf32>
    %8 = arith.maximumf %6, %7 : vector<8x32xf32>
    %c0_6 = arith.constant 0 : index
    %c0_7 = arith.constant 0 : index
    %9 = vector.load %arg4[%c0_6, %c0_7] : memref<32x32xbf16, #tpu.memory_space<vmem>>, vector<32x32xbf16>
    %c0_8 = arith.constant 0 : index
    %c0_9 = arith.constant 0 : index
    %10 = vector.load %arg5[%c0_8, %c0_9] : memref<1x32xf32, #tpu.memory_space<vmem>>, vector<1x32xf32>
    %11 = arith.truncf %8 : vector<8x32xf32> to vector<8x32xbf16>
    %cst_10 = arith.constant dense<0.000000e+00> : vector<8x32xf32>
    %12 = tpu.matmul %11, %9, %cst_10 {dimension_numbers = #tpu.dot_dimension_numbers<[1], [0], [0], [1], [0, 0, 1, 1], [], []>} : vector<8x32xbf16>, vector<32x32xbf16>, vector<8x32xf32> -> vector<8x32xf32>
    %13 = vector.broadcast %10 : vector<1x32xf32> to vector<8x32xf32>
    %14 = arith.addf %12, %13 : vector<8x32xf32>
    %cst_11 = arith.constant 0.000000e+00 : f32
    %15 = vector.broadcast %cst_11 : f32 to vector<8x32xf32>
    %16 = arith.maximumf %14, %15 : vector<8x32xf32>
    %c0_12 = arith.constant 0 : index
    %c0_13 = arith.constant 0 : index
    %17 = vector.load %arg6[%c0_12, %c0_13] : memref<32x8xbf16, #tpu.memory_space<vmem>>, vector<32x8xbf16>
    %c0_14 = arith.constant 0 : index
    %c0_15 = arith.constant 0 : index
    %18 = vector.load %arg7[%c0_14, %c0_15] : memref<1x8xf32, #tpu.memory_space<vmem>>, vector<1x8xf32>
    %19 = arith.truncf %16 : vector<8x32xf32> to vector<8x32xbf16>
    %cst_16 = arith.constant dense<0.000000e+00> : vector<8x8xf32>
    %20 = tpu.matmul %19, %17, %cst_16 {dimension_numbers = #tpu.dot_dimension_numbers<[1], [0], [0], [1], [0, 0, 1, 1], [], []>} : vector<8x32xbf16>, vector<32x8xbf16>, vector<8x8xf32> -> vector<8x8xf32>
    %21 = vector.broadcast %18 : vector<1x8xf32> to vector<8x8xf32>
    %22 = arith.addf %20, %21 : vector<8x8xf32>
    %23 = arith.negf %22 : vector<8x8xf32>
    %24 = math.exp %23 : vector<8x8xf32>
    %cst_17 = arith.constant 1.000000e+00 : f32
    %25 = vector.broadcast %cst_17 : f32 to vector<8x8xf32>
    %26 = arith.addf %25, %24 : vector<8x8xf32>
    %27 = arith.divf %25, %26 : vector<8x8xf32>
    %c0_18 = arith.constant 0 : index
    %c0_19 = arith.constant 0 : index
    %28 = vector.load %arg8[%c0_18, %c0_19] : memref<8x8xf32, #tpu.memory_space<vmem>>, vector<8x8xf32>
    tpu.vector_store %arg8[%c0_18, %c0_19], %27 {strides = array<i32>} : memref<8x8xf32, #tpu.memory_space<vmem>>, vector<8x8xf32>,
    return
  }
  func.func @transform_0(%arg0: i32) -> (i32, i32) {
    %c0_i32 = arith.constant 0 : i32
    %c0_i32_0 = arith.constant 0 : i32
    return %arg0, %c0_i32 : i32, i32
  }
  func.func @transform_1(%arg0: i32) -> (i32, i32) {
    %c0_i32 = arith.constant 0 : i32
    %c0_i32_0 = arith.constant 0 : i32
    %c0_i32_1 = arith.constant 0 : i32
    return %c0_i32, %c0_i32_0 : i32, i32
  }
  func.func @transform_2(%arg0: i32) -> (i32, i32) {
    %c0_i32 = arith.constant 0 : i32
    %c0_i32_0 = arith.constant 0 : i32
    %c0_i32_1 = arith.constant 0 : i32
    return %c0_i32, %c0_i32_0 : i32, i32
  }
  func.func @transform_3(%arg0: i32) -> (i32, i32) {
    %c0_i32 = arith.constant 0 : i32
    %c0_i32_0 = arith.constant 0 : i32
    %c0_i32_1 = arith.constant 0 : i32
    return %c0_i32, %c0_i32_0 : i32, i32
  }
  func.func @transform_4(%arg0: i32) -> (i32, i32) {
    %c0_i32 = arith.constant 0 : i32
    %c0_i32_0 = arith.constant 0 : i32
    %c0_i32_1 = arith.constant 0 : i32
    return %c0_i32, %c0_i32_0 : i32, i32
  }
  func.func @transform_5(%arg0: i32) -> (i32, i32) {
    %c0_i32 = arith.constant 0 : i32
    %c0_i32_0 = arith.constant 0 : i32
    %c0_i32_1 = arith.constant 0 : i32
    return %c0_i32, %c0_i32_0 : i32, i32
  }
  func.func @transform_6(%arg0: i32) -> (i32, i32) {
    %c0_i32 = arith.constant 0 : i32
    %c0_i32_0 = arith.constant 0 : i32
    %c0_i32_1 = arith.constant 0 : i32
    return %c0_i32, %c0_i32_0 : i32, i32
  }
  func.func @transform_7(%arg0: i32) -> (i32, i32) {
    %c0_i32 = arith.constant 0 : i32
    %c0_i32_0 = arith.constant 0 : i32
    return %arg0, %c0_i32 : i32, i32
  }
}

</mosaic_0001>

<bundles_post_ra>
// kernel: tpu_custom_call.1
= control target key start
LH: loop header
LB: loop body
LE: loop exit
PB: predicated region body
PF: predicated region fallthrough
CT: control target
= control target key end

     0   :  { %s1446_s0 = inlined_call_operand.vmem [shape: f32[8,1024], index: 0, kind: input, shape index: {}]   ;;  %s1447_s1 = inlined_call_operand.vmem [shape: bf16[1024,32], index: 1, kind: input, shape index: {}]   ;;  %s1448_s2 = inlined_call_operand.vmem [shape: f32[1,32], index: 2, kind: input, shape index: {}]   ;;  %s1449_s3 = inlined_call_operand.vmem [shape: bf16[32,32], index: 3, kind: input, shape index: {}]   ;;  %s1450_s4 = inlined_call_operand.vmem [shape: f32[1,32], index: 4, kind: input, shape index: {}]   ;;  %s1451_s5 = inlined_call_operand.vmem [shape: bf16[32,8], index: 5, kind: input, shape index: {}]   ;;  %s1452_s6 = inlined_call_operand.vmem [shape: f32[1,8], index: 6, kind: input, shape index: {}]   ;;  %s1453_s7 = inlined_call_operand.hbm [shape: f32[8,8], index: 7, kind: output, shape index: {}]  }
   0x1   :  { %v1069_v0 = vld [vmem:[%s1447_s1 + $0x78] sm:$0xff]   ;;  %v1073_v4 = vld [vmem:[%s1447_s1 + $0x70] sm:$0xff]   ;;  %v1077_v8 = vld [vmem:[%s1447_s1 + $0x68] sm:$0xff]  }
   0x2   :  { %v1070_v1 = vld [vmem:[%s1447_s1 + $0xf8] sm:$0xff]   ;;  %956 = vmatprep.subr.bf16.mxu0 %v1069_v0  ;;  %v1074_v5 = vld [vmem:[%s1447_s1 + $0xf0] sm:$0xff]   ;;  %v1078_v9 = vld [vmem:[%s1447_s1 + $0xe8] sm:$0xff]  }
   0x3   :  { %v1071_v2 = vld [vmem:[%s1447_s1 + $0x38] sm:$0xff]   ;;  %978 = vmatprep.subr.bf16.mxu1 %v1070_v1  ;;  %v1075_v6 = vld [vmem:[%s1447_s1 + $0x30] sm:$0xff]   ;;  %v1079_v10 = vld [vmem:[%s1447_s1 + $0x28] sm:$0xff]  }
   0x4   :  { %v1072_v3 = vld [vmem:[%s1447_s1 + $0xb8] sm:$0xff]   ;;  %957 = vmatpush3.bf16.msra.mxu0 %v1071_v2  ;;  %v1076_v7 = vld [vmem:[%s1447_s1 + $0xb0] sm:$0xff]   ;;  %v1080_v11 = vld [vmem:[%s1447_s1 + $0xa8] sm:$0xff]  }
   0x5   :  { %979 = vmatpush3.bf16.msra.mxu1 %v1072_v3  ;;  %958 = vmatprep.subr.bf16.mxu0 %v1073_v4  ;;  %v1081_v12 = vld [vmem:[%s1447_s1 + $0x60] sm:$0xff]   ;;  %v1085_v16 = vld [vmem:[%s1447_s1 + $0x58] sm:$0xff]   ;;  %v1089_v20 = vld [vmem:[%s1447_s1 + $0x50] sm:$0xff]  }
   0x6   :  { %980 = vmatprep.subr.bf16.mxu1 %v1074_v5  ;;  %v1082_v13 = vld [vmem:[%s1447_s1 + $0xe0] sm:$0xff]   ;;  %v1086_v17 = vld [vmem:[%s1447_s1 + $0xd8] sm:$0xff]   ;;  %v1090_v21 = vld [vmem:[%s1447_s1 + $0xd0] sm:$0xff]  }
   0x7   :  { %v1083_v14 = vld [vmem:[%s1447_s1 + $0x20] sm:$0xff]   ;;  %v1087_v18 = vld [vmem:[%s1447_s1 + $0x18] sm:$0xff]   ;;  %v1091_v22 = vld [vmem:[%s1447_s1 + $0x10] sm:$0xff]  }
   0x8   :  { %959 = vmatpush3.bf16.msra.mxu0 %v1075_v6  ;;  %v1084_v15 = vld [vmem:[%s1447_s1 + $0xa0] sm:$0xff]   ;;  %v1088_v19 = vld [vmem:[%s1447_s1 + $0x98] sm:$0xff]   ;;  %v1092_v23 = vld [vmem:[%s1447_s1 + $0x90] sm:$0xff]  }
   0x9   :  { %981 = vmatpush3.bf16.msra.mxu1 %v1076_v7  ;;  %960 = vmatprep.subr.bf16.mxu0 %v1077_v8  ;;  %v1093_v24 = vld [vmem:[%s1447_s1 + $0x48] sm:$0xff]   ;;  %v1097_v28 = vld [vmem:[%s1447_s1 + $0x40] sm:$0xff]   ;;  %v31_v33 = vld [vmem:[%s1446_s0 + $0x18] sm:$0xff] }
   0xa   :  { %982 = vmatprep.subr.bf16.mxu1 %v1078_v9  ;;  %v1094_v25 = vld [vmem:[%s1447_s1 + $0xc8] sm:$0xff]   ;;  %v1098_v29 = vld [vmem:[%s1447_s1 + $0xc0] sm:$0xff]   ;;  %v168_v36 = vpack.c.bf16 %v31_v33, %v31_v33  ;;  %v30_v38 = vld [vmem:[%s1446_s0 + $0x10] sm:$0xff] }
   0xb   :  { %v1095_v26 = vld [vmem:[%s1447_s1 + $0x8] sm:$0xff]   ;;  %v1099_v30 = vld [vmem:[%s1447_s1] sm:$0xff]   ;;  %v167_v39 = vpack.c.bf16 %v30_v38, %v30_v38  ;;  %v1101_v40 = vld [vmem:[%s1447_s1 + $0x178] sm:$0xff]  }
   0xc   :  { %961 = vmatpush3.bf16.msra.mxu0 %v1079_v10  ;;  %v1096_v27 = vld [vmem:[%s1447_s1 + $0x88] sm:$0xff]   ;;  %v1100_v31 = vld [vmem:[%s1447_s1 + $0x80] sm:$0xff]   ;;  %635 = vmatprep.mubr.bf16.mxu1 %v168_v36  ;;  %v1102_v41 = vld [vmem:[%s1447_s1 + $0x1f8] sm:$0xff]  }
   0xd   :  { %983 = vmatpush3.bf16.msra.mxu1 %v1080_v11  ;;  %962 = vmatprep.subr.bf16.mxu0 %v1081_v12  ;;  %v29_v32 = vld [vmem:[%s1446_s0 + $0x8] sm:$0xff]  ;;  %v28_v34 = vld [vmem:[%s1446_s0] sm:$0xff]  ;;  %v1103_v42 = vld [vmem:[%s1447_s1 + $0x138] sm:$0xff]  }
   0xe   :  { %984 = vmatprep.subr.bf16.mxu1 %v1082_v13  ;;  %v166_v35 = vpack.c.bf16 %v29_v32, %v29_v32  ;;  %v165_v37 = vpack.c.bf16 %v28_v34, %v28_v34  ;;  %v1104_v43 = vld [vmem:[%s1447_s1 + $0x1b8] sm:$0xff]   ;;  %v1105_v44 = vld [vmem:[%s1447_s1 + $0x170] sm:$0xff]   ;;  %v1109_v48 = vld [vmem:[%s1447_s1 + $0x168] sm:$0xff]  }
   0xf   :  { %v1106_v45 = vld [vmem:[%s1447_s1 + $0x1f0] sm:$0xff]   ;;  %v1110_v49 = vld [vmem:[%s1447_s1 + $0x1e8] sm:$0xff]   ;;  %v1113_v52 = vld [vmem:[%s1447_s1 + $0x160] sm:$0xff]  }
  0x10   :  { %963 = vmatpush3.bf16.msra.mxu0 %v1083_v14  ;;  %595 = vmatprep.mubr.bf16.mxu0 %v166_v35  ;;  %v1107_v46 = vld [vmem:[%s1447_s1 + $0x130] sm:$0xff]   ;;  %v1111_v50 = vld [vmem:[%s1447_s1 + $0x128] sm:$0xff]   ;;  %v1114_v53 = vld [vmem:[%s1447_s1 + $0x1e0] sm:$0xff]  }
  0x11   :  { %985 = vmatpush3.bf16.msra.mxu1 %v1084_v15  ;;  %964 = vmatprep.subr.bf16.mxu0 %v1085_v16  ;;  %v1108_v47 = vld [vmem:[%s1447_s1 + $0x1b0] sm:$0xff]   ;;  %v1112_v51 = vld [vmem:[%s1447_s1 + $0x1a8] sm:$0xff]   ;;  %v1115_v54 = vld [vmem:[%s1447_s1 + $0x120] sm:$0xff]  }
  0x12   :  { %986 = vmatprep.subr.bf16.mxu1 %v1086_v17  ;;  %v1116_v55 = vld [vmem:[%s1447_s1 + $0x1a0] sm:$0xff]   ;;  %v1117_v56 = vld [vmem:[%s1447_s1 + $0x158] sm:$0xff]   ;;  %v1121_v60 = vld [vmem:[%s1447_s1 + $0x150] sm:$0xff]  }
  0x13   :  { %v1118_v57 = vld [vmem:[%s1447_s1 + $0x1d8] sm:$0xff]   ;;  %v1122_v61 = vld [vmem:[%s1447_s1 + $0x1d0] sm:$0xff]   ;;  %v1125_v0 = vld [vmem:[%s1447_s1 + $0x148] sm:$0xff]  }
  0x14   :  { %965 = vmatpush3.bf16.msra.mxu0 %v1087_v18  ;;  %v1119_v58 = vld [vmem:[%s1447_s1 + $0x118] sm:$0xff]   ;;  %v1123_v62 = vld [vmem:[%s1447_s1 + $0x110] sm:$0xff]   ;;  %v1126_v1 = vld [vmem:[%s1447_s1 + $0x1c8] sm:$0xff]  }
  0x15   :  { %987 = vmatpush3.bf16.msra.mxu1 %v1088_v19  ;;  %966 = vmatprep.subr.bf16.mxu0 %v1089_v20  ;;  %v1120_v59 = vld [vmem:[%s1447_s1 + $0x198] sm:$0xff]   ;;  %v1124_v63 = vld [vmem:[%s1447_s1 + $0x190] sm:$0xff]   ;;  %v1127_v2 = vld [vmem:[%s1447_s1 + $0x108] sm:$0xff]  }
  0x16   :  { %988 = vmatprep.subr.bf16.mxu1 %v1090_v21  ;;  %v1128_v3 = vld [vmem:[%s1447_s1 + $0x188] sm:$0xff]   ;;  %v1129_v4 = vld [vmem:[%s1447_s1 + $0x140] sm:$0xff]   ;;  %v35_v9 = vld [vmem:[%s1446_s0 + $0x38] sm:$0xff] }
  0x17   :  { %v1130_v5 = vld [vmem:[%s1447_s1 + $0x1c0] sm:$0xff]   ;;  %v33_v8 = vld [vmem:[%s1446_s0 + $0x28] sm:$0xff]  ;;  %v172_v11 = vpack.c.bf16 %v35_v9, %v35_v9  ;;  %v34_v13 = vld [vmem:[%s1446_s0 + $0x30] sm:$0xff] }
  0x18   :  { %967 = vmatpush3.bf16.msra.mxu0 %v1091_v22  ;;  %v1131_v6 = vld [vmem:[%s1447_s1 + $0x100] sm:$0xff]   ;;  %v170_v10 = vpack.c.bf16 %v33_v8, %v33_v8  ;;  %v171_v15 = vpack.c.bf16 %v34_v13, %v34_v13 }
  0x19   :  { %989 = vmatpush3.bf16.msra.mxu1 %v1092_v23  ;;  %968 = vmatprep.subr.bf16.mxu0 %v1093_v24  ;;  %v1132_v7 = vld [vmem:[%s1447_s1 + $0x180] sm:$0xff]  }
  0x1a   :  { %990 = vmatprep.subr.bf16.mxu1 %v1094_v25  ;;  %v32_v12 = vld [vmem:[%s1446_s0 + $0x20] sm:$0xff] }
  0x1b   :  { %v169_v14 = vpack.c.bf16 %v32_v12, %v32_v12 }
  0x1c   :  { %969 = vmatpush3.bf16.msra.mxu0 %v1095_v26 }
  0x1d   :  { %991 = vmatpush3.bf16.msra.mxu1 %v1096_v27  ;;  %970 = vmatprep.subr.bf16.mxu0 %v1097_v28 }
  0x1e   :  { %992 = vmatprep.subr.bf16.mxu1 %v1098_v29 }
  0x20   :  { %971 = vmatpush3.bf16.msra.mxu0 %v1099_v30 }
  0x21   :  { %993 = vmatpush3.bf16.msra.mxu1 %v1100_v31  ;;  %1000 = vmatprep.subr.bf16.mxu0 %v1101_v40 }
  0x22   :  { %1022 = vmatprep.subr.bf16.mxu1 %v1102_v41 }
  0x23   :  { %596 = vmatmul.mubr.bf16.vlgmr.msra.gmra.mxu0 %v165_v37 }
  0x24   :  { %636 = vmatmul.mubr.bf16.vlgmr.msra.gmra.mxu1 %v167_v39  ;;  %1001 = vmatpush3.bf16.msra.mxu0 %v1103_v42 }
  0x25   :  { %1023 = vmatpush3.bf16.msra.mxu1 %v1104_v43  ;;  %1002 = vmatprep.subr.bf16.mxu0 %v1105_v44 }
  0x26   :  { %1024 = vmatprep.subr.bf16.mxu1 %v1106_v45  ;;  %675 = vmatprep.mubr.bf16.mxu0 %v170_v10 }
  0x27   :  { %715 = vmatprep.mubr.bf16.mxu1 %v172_v11 }
  0x28   :  { %1003 = vmatpush3.bf16.msra.mxu0 %v1107_v46 }
  0x29   :  { %1025 = vmatpush3.bf16.msra.mxu1 %v1108_v47  ;;  %1004 = vmatprep.subr.bf16.mxu0 %v1109_v48 }
  0x2a   :  { %1026 = vmatprep.subr.bf16.mxu1 %v1110_v49 }
  0x2c   :  { %1005 = vmatpush3.bf16.msra.mxu0 %v1111_v50 }
  0x2d   :  { %1027 = vmatpush3.bf16.msra.mxu1 %v1112_v51  ;;  %1006 = vmatprep.subr.bf16.mxu0 %v1113_v52 }
  0x2e   :  { %1028 = vmatprep.subr.bf16.mxu1 %v1114_v53 }
  0x30   :  { %1007 = vmatpush3.bf16.msra.mxu0 %v1115_v54 }
  0x31   :  { %1029 = vmatpush3.bf16.msra.mxu1 %v1116_v55  ;;  %1008 = vmatprep.subr.bf16.mxu0 %v1117_v56 }
  0x32   :  { %1030 = vmatprep.subr.bf16.mxu1 %v1118_v57 }
  0x34   :  { %1009 = vmatpush3.bf16.msra.mxu0 %v1119_v58 }
  0x35   :  { %1031 = vmatpush3.bf16.msra.mxu1 %v1120_v59  ;;  %1010 = vmatprep.subr.bf16.mxu0 %v1121_v60 }
  0x36   :  { %1032 = vmatprep.subr.bf16.mxu1 %v1122_v61 }
  0x38   :  { %1011 = vmatpush3.bf16.msra.mxu0 %v1123_v62 }
  0x39   :  { %1033 = vmatpush3.bf16.msra.mxu1 %v1124_v63  ;;  %1012 = vmatprep.subr.bf16.mxu0 %v1125_v0 }
  0x3a   :  { %1034 = vmatprep.subr.bf16.mxu1 %v1126_v1 }
  0x3c   :  { %1013 = vmatpush3.bf16.msra.mxu0 %v1127_v2 }
  0x3d   :  { %1035 = vmatpush3.bf16.msra.mxu1 %v1128_v3  ;;  %1014 = vmatprep.subr.bf16.mxu0 %v1129_v4 }
  0x3e   :  { %1036 = vmatprep.subr.bf16.mxu1 %v1130_v5 }
  0x40   :  { %1015 = vmatpush3.bf16.msra.mxu0 %v1131_v6 }
  0x41   :  { %1037 = vmatpush3.bf16.msra.mxu1 %v1132_v7 }
  0x43   :  { %676 = vmatmul.mubr.bf16.vlgmr.msra.gmra.mxu0 %v169_v14 }
  0x44   :  { %12 = vsyncpa [#allocation3], 0  ;;  %716 = vmatmul.mubr.bf16.vlgmr.msra.gmra.mxu1 %v171_v15  ;;  %v1133_v16 = vld [vmem:[%s1449_s3 + $0x8] sm:$0xff]   ;;  %v1163_v17 = vmov 0.0   ;;  %v1134_v18 = vld [vmem:[%s1449_s3] sm:$0xff]   ;;  %vm1164_vm0 = vmmov 0  }
  0x45   :  { %1050 = vmatprep.subr.bf16.mxu0 %v1163_v17  ;;  %1058 = vmatprep.subr.bf16.mxu1 %v1163_v17  ;;  %v1135_v19 = vld [vmem:[%s1451_s5 + $0x8] sm:$0xff]   ;;  %v882_v29 = vld [vmem:[%s1448_s2] ss:$0 sm:$0xff]  ;;  %vm748_vm1 = vcmask 261120   ;;  %vm866_vm2 = vcmask 64512  }
  0x46   :  { %1051 = vmatpush3.bf16.msra.mxu0 %v1133_v16  ;;  %1054 = vmatprep.mubr.msk.bf16.mxu0 %vm1164_vm0, %v1163_v17  ;;  %v1136_v47 = vld [vmem:[%s1451_s5] sm:$0xff]  }
  0x47   :  { %1052 = vmatprep.subr.bf16.mxu0 %v1163_v17  ;;  %1062 = vmatprep.mubr.msk.bf16.mxu1 %vm1164_vm0, %v1163_v17  ;;  %v947_v48 = vld [vmem:[%s1450_s4] ss:$0 sm:$0xff]  ;;  %s1165_s4 = smov [#allocation2]  }
  0x48   :  { %1059 = vmatpush3.bf16.msra.mxu1 %v1135_v19  ;;  %v951_v56 = vld [vmem:[%s1452_s6] ss:$0 sm:$0xff]  ;;  %s874_s5 = sshll.u32 %s1165_s4, 4  ;;  %s875_s5 = int_to_ptr.vmem [resolvable:$true] %s874_s5 }
  0x49   :  { %1060 = vmatprep.subr.bf16.mxu1 %v1163_v17  ;;  %s1141_s17 = scalar_lea.vmem %s875_s5, 128  ;;  %p1146_p1 = scmp.lt.s32.totalorder %s875_s5, %s875_s5 }
  0x4a   :  { %1053 = vmatpush3.bf16.msra.mxu0 %v1134_v18  ;;  %p1142_p0 = scmp.ne.s32.totalorder %s875_s5, %s1141_s17  ;;  %p1147_p2 = scmp.lt.s32.totalorder %s1141_s17, %s1141_s17 }
  0x4c   :  { %1061 = vmatpush3.bf16.msra.mxu1 %v1136_v47  ;;  %p1148_p3 = por %p1147_p2, %p1146_p1 }
  0x4e   :  { %p1149_p4 = pnand %p1148_p3, %p1142_p0 }
  0xe3   :  { %v972_v20 = vpop.f32.mrf.mxu0 }
  0xe4   :  { %v994_v21 = vpop.f32.mrf.mxu1 }
  0xe5   :  { %v973_v22 = vpop.f32.mrf.mxu0 }
  0xe6   :  { %v995_v23 = vpop.f32.mrf.mxu1  ;;  %v974_v28 = vadd.f32 %v973_v22, %v972_v20 }
  0xe7   :  { %v975_v24 = vpop.f32.mrf.mxu0  ;;  %v996_v31 = vadd.f32 %v995_v23, %v994_v21 }
  0xe8   :  { %v997_v25 = vpop.f32.mrf.mxu1  ;;  %v598_v30 = vadd.f32 %v974_v28, %v882_v29 }
  0xe9   :  { %v976_v26 = vpop.f32.mrf.mxu0 }
  0xea   :  { %v998_v27 = vpop.f32.mrf.mxu1  ;;  %v638_v35 = vadd.f32 %v996_v31, %v598_v30 }
 0x103   :  { %v1016_v32 = vpop.f32.mrf.mxu0 }
 0x104   :  { %v1038_v33 = vpop.f32.mrf.mxu1 }
 0x105   :  { %v1017_v34 = vpop.f32.mrf.mxu0 }
 0x106   :  { %v1018_v36 = vadd.f32 %v1017_v34, %v1016_v32  ;;  %v1039_v37 = vpop.f32.mrf.mxu1 }
 0x107   :  { %v1019_v38 = vpop.f32.mrf.mxu0  ;;  %v1040_v40 = vadd.f32 %v1039_v37, %v1038_v33 }
 0x108   :  { %v678_v39 = vadd.f32 %v1018_v36, %v638_v35  ;;  %v1041_v41 = vpop.f32.mrf.mxu1 }
 0x109   :  { %v1020_v42 = vpop.f32.mrf.mxu0 }
 0x10a   :  { %v718_v43 = vadd.f32 %v1040_v40, %v678_v39  ;;  %v1042_v44 = vpop.f32.mrf.mxu1 }
 0x10c   :  { %v723_v45 = vmax.f32 %v718_v43, 0.0 }
 0x10e   :  { %v729_v46 = vpack.c.bf16 %v723_v45, %v723_v45 }
 0x110   :  { %1055 = vmatmul.mubr.msk.bf16.vlgmr.msra.gmra.mxu0 %vm748_vm1, %v729_v46 }
 0x1d0   :  { %v786_v49 = vpop.f32.mrf.mxu0 }
 0x1d1   :  { %v787_v50 = vadd.f32 %v947_v48, %v786_v49 }
 0x1d2   :  { %v1056_v51 = vpop.f32.mrf.mxu0 }
 0x1d3   :  { %v792_v52 = vmax.f32 %v787_v50, 0.0 }
 0x1d4   :  { %v789_v53 = vpop.f32.mrf.mxu0 }
 0x1d5   :  { %v798_v54 = vpack.c.bf16 %v792_v52, %v792_v52 }
 0x1d6   :  { %v1057_v55 = vpop.f32.mrf.mxu0 }
 0x1d7   :  { %1063 = vmatmul.mubr.msk.bf16.vlgmr.msra.gmra.mxu1 %vm748_vm1, %v798_v54 }
 0x297   :  { %v854_v57 = vpop.f32.mrf.mxu1 }
 0x298   :  { %v855_v58 = vadd.f32 %v951_v56, %v854_v57 }
 0x299   :  { %v1064_v59 = vpop.f32.mrf.mxu1 }
 0x29a   :  { %v955_v60 = vmul.f32 -1.442695, %v855_v58 }
 0x29b   :  { %v857_v61 = vpop.f32.mrf.mxu1 }
 0x29c   :  { %1137 = vpow2.f32 %v955_v60 }
 0x29d   :  { %v1065_v62 = vpop.f32.mrf.mxu1 }
 0x2a9   :  { %v1138_v63 = vpop.eup %1137 }
 0x2aa   :  { %v863_v0 = vadd.f32 1.0, %v1138_v63 }
 0x2ac   :  { %1139 = vrcp.f32 %v863_v0 }
 0x2b9   :  { %v1140_v1 = vpop.eup %1139 }
 0x2ba   :  { %867 = vst.msk [vmem:[#allocation2] sm:$0xff] %vm866_vm2, %v1140_v1 }
 0x2bb   :  { %1152 = shalt.err (!%p1149_p4)
}
 0x2bc   :  { %877 = dma.vmem_to_hbm [thread:$0]  %s875_s5, 128, %s1453_s7, [#allocation3]  }
 0x2bd   :  { %1161 = dma.done.wait [#allocation3], 128  }
 0x2be   :  { %1162 = vsyncadd [#allocation3], 4294967168 }
 0x2bf   :  { %881 = vsyncpa [#allocation3], 1 }

</bundles_post_ra>
